<compile_context>
chip_gen: v6e
topology: v6e:2x2x1
jax: 0.10.0
libtpu: 0.0.40
codegen_flags: <defaults>
</compile_context>

<pallas_src>
import functools

import jax
import jax.numpy as jnp
from jax import lax
from jax.experimental import pallas as pl
from jax.experimental.pallas import tpu as pltpu

EPS = 1e-5          # nn.BatchNorm1d default eps
LANE = 128          # TPU lane width
SUBLANE = 8         # f32 sublane width


def _round_up(v, m):
    return (v + m - 1) // m * m


# ---------------------------------------------------------------------------
# Pallas kernel: whole residual-block forward on a (C, B*Lp) slab
# ---------------------------------------------------------------------------
def _resblock_kernel(*refs, has_proj, has_pad, n_valid):
    it = iter(refs)
    x_ref = next(it)
    w1_ref, g1_ref, b1_ref = next(it), next(it), next(it)
    w2_ref, g2_ref, b2_ref = next(it), next(it), next(it)
    if has_proj:
        wsc_ref, gsc_ref, bsc_ref = next(it), next(it), next(it)
    if has_pad:
        mv = next(it)[...]              # (1, N): 1 on valid lanes, 0 on padding
        mnl = mnr = None
    else:
        mv = None
        mnl = next(it)[...]             # (1, N): 0 on each segment's first lane
        mnr = next(it)[...]             # (1, N): 0 on each segment's last lane
    o_ref = next(it)

    x = x_ref[...]                      # (CinP, N) f32; padded lanes/channels are zero
    N = x.shape[-1]
    inv_n = jnp.float32(1.0 / n_valid)

    def mask_valid(a):                  # keep padded lanes exactly zero
        return a * mv if has_pad else a

    def conv3(h, w_ref):
        # k=3 / stride=1 / pad=1 conv as three accumulated MXU dots (per tap).
        # Tap views are built with pltpu.roll on the f32 activation (XLU slot),
        # then cast to bf16 for the MXU; accumulation stays f32.
        left = pltpu.roll(h, 1, 1)       # left[l]  = h[l-1]
        right = pltpu.roll(h, N - 1, 1)  # right[l] = h[l+1]
        if not has_pad:                  # no zero pad lane -> mask segment edges
            left = left * mnl
            right = right * mnr
        acc = jnp.dot(w_ref[1], h.astype(jnp.bfloat16),
                      preferred_element_type=jnp.float32)
        acc += jnp.dot(w_ref[0], left.astype(jnp.bfloat16),
                       preferred_element_type=jnp.float32)
        acc += jnp.dot(w_ref[2], right.astype(jnp.bfloat16),
                       preferred_element_type=jnp.float32)
        return acc

    def bn_fold(y, gamma, beta):
        # Training-mode BN folded to a per-channel affine; one f32 stats pass
        # (sum & sum of squares) over the already lane-masked activation.
        mean = jnp.sum(y, axis=-1, keepdims=True) * inv_n
        msq = jnp.sum(y * y, axis=-1, keepdims=True) * inv_n
        var = msq - mean * mean          # biased variance (PyTorch train mode)
        scale = gamma * lax.rsqrt(var + EPS)
        shift = beta - mean * scale
        return scale, shift

    # conv1 -> bn1 -> relu   (re-masked so padded lanes stay zero for conv2)
    y1 = mask_valid(conv3(x, w1_ref))
    s1, t1 = bn_fold(y1, g1_ref[...], b1_ref[...])
    h = mask_valid(jnp.maximum(y1 * s1 + t1, 0.0))

    # conv2 -> bn2   (bn2 apply fused into the residual tail below)
    y2 = mask_valid(conv3(h, w2_ref))
    s2, t2 = bn_fold(y2, g2_ref[...], b2_ref[...])

    # shortcut: 1x1 conv + bn (padded input lanes are already zero), or identity
    if has_proj:
        ysc = jnp.dot(wsc_ref[...], x.astype(jnp.bfloat16),
                      preferred_element_type=jnp.float32)
        ss, ts = bn_fold(ysc, gsc_ref[...], bsc_ref[...])
        res = ysc * ss + ts
    else:
        res = x

    # fused tail: bn2 apply + residual add + final relu, lane-dense f32 store.
    # NOTE: padded lanes contain BN-shift garbage; the wrapper slices them off.
    o_ref[...] = jnp.maximum(y2 * s2 + t2 + res, 0.0)


# ---------------------------------------------------------------------------
# Wrapper: layout plumbing (NCL -> padded lane-dense slab) + pallas_call
# ---------------------------------------------------------------------------
def lightweight_residual_block(x, params, *, stride=1):
    assert stride == 1, "only stride=1 is implemented"  # TODO(synk): stride > 1
    B, Cin, L = x.shape
    w1 = params["conv1_w"]                               # (Cout, Cin, 3)
    Cout = w1.shape[0]
    has_proj = (stride != 1) or (Cin != Cout)

    # channel padding to sublane multiples, lane padding to a 128 multiple
    CinP = _round_up(Cin, SUBLANE)
    CoutP = _round_up(Cout, SUBLANE)
    Lp = _round_up(L, LANE)
    has_pad = Lp > L
    N = B * Lp

    # (B, Cin, L) -> zero-pad channels/length -> (CinP, B*Lp)   [layout plumbing]
    xp = jnp.pad(x.astype(jnp.float32),
                 ((0, 0), (0, CinP - Cin), (0, Lp - L)))
    x2d = jnp.transpose(xp, (1, 0, 2)).reshape(CinP, N)

    def prep_w(w, cin_pad):
        # (Cout, cin, 3) -> tap-major (3, CoutP, cin_pad) bf16, zero padded
        co, ci, _ = w.shape
        wp = jnp.pad(w, ((0, CoutP - co), (0, cin_pad - ci), (0, 0)))
        return jnp.transpose(wp, (2, 0, 1)).astype(jnp.bfloat16)

    def prep_v(v):
        return jnp.pad(v, (0, CoutP - v.shape[0])).reshape(CoutP, 1).astype(jnp.float32)

    args = [
        x2d,
        prep_w(params["conv1_w"], CinP),
        prep_v(params["bn1_g"]), prep_v(params["bn1_b"]),
        prep_w(params["conv2_w"], CoutP),
        prep_v(params["bn2_g"]), prep_v(params["bn2_b"]),
    ]
    if has_proj:
        wsc = params["sc_w"][:, :, 0]                     # (Cout, Cin)
        wscp = jnp.pad(wsc, ((0, CoutP - Cout), (0, CinP - Cin))).astype(jnp.bfloat16)
        args += [wscp, prep_v(params["sc_bn_g"]), prep_v(params["sc_bn_b"])]

    # masks precomputed on the host/XLA side (no in-kernel integer modulo)
    lane_in_seg = jnp.arange(N, dtype=jnp.int32) % Lp
    if has_pad:
        args.append((lane_in_seg < L).astype(jnp.float32).reshape(1, N))
    else:
        args.append((lane_in_seg != 0).astype(jnp.float32).reshape(1, N))
        args.append((lane_in_seg != (L - 1)).astype(jnp.float32).reshape(1, N))

    # VMEM budget: whole-slab design (fine for small/medium shapes).
    # TODO(synk): batch/lane-tiled grid + two-pass BN for slabs beyond this.
    vmem_est = 4 * N * (4 * CinP + 12 * CoutP) + 4 * 3 * SUBLANE * N
    assert vmem_est < 48 * 2**20, (
        "slab too large for the un-tiled kernel; needs the tiled two-pass BN variant")
    vmem_limit = int(min(64 * 2**20, max(8 * 2**20, 2 * vmem_est)))

    mxu_flops = 2 * N * (3 * CinP * CoutP + 3 * CoutP * CoutP)
    if has_proj:
        mxu_flops += 2 * N * CinP * CoutP
    cost = pl.CostEstimate(
        flops=int(mxu_flops + 24 * CoutP * N),
        transcendentals=int((3 if has_proj else 2) * CoutP),
        bytes_accessed=int(4 * N * (CinP + CoutP) + 4 * 3 * N + 2 * 6 * CoutP * CoutP),
    )

    kernel = functools.partial(_resblock_kernel, has_proj=has_proj,
                               has_pad=has_pad, n_valid=B * L)
    vmem = pl.BlockSpec(memory_space=pltpu.MemorySpace.VMEM)
    out2d = pl.pallas_call(
        kernel,
        out_shape=jax.ShapeDtypeStruct((CoutP, N), jnp.float32),
        in_specs=[vmem] * len(args),
        out_specs=vmem,
        compiler_params=pltpu.CompilerParams(vmem_limit_bytes=vmem_limit),
        cost_estimate=cost,
    )(*args)

    # (CoutP, B*Lp) -> (B, Cout, L)
    out = out2d.reshape(CoutP, B, Lp)[:Cout, :, :L]
    return jnp.transpose(out, (1, 0, 2))


# ---------------------------------------------------------------------------
# Pure-JAX reference (independent f32 formulation via lax.conv_general_dilated)
# ---------------------------------------------------------------------------
def _ref_forward(x, params, stride=1):
    def conv(a, w, s, p):
        return lax.conv_general_dilated(
            a, w, (s,), [(p, p)], dimension_numbers=("NCH", "OIH", "NCH"))

    def bn(a, g, b):
        mean = a.mean(axis=(0, 2), keepdims=True)
        var = ((a - mean) ** 2).mean(axis=(0, 2), keepdims=True)
        return (a - mean) * lax.rsqrt(var + EPS) * g[None, :, None] + b[None, :, None]

    out = conv(x, params["conv1_w"], stride, 1)
    out = jax.nn.relu(bn(out, params["bn1_g"], params["bn1_b"]))
    out = bn(conv(out, params["conv2_w"], 1, 1), params["bn2_g"], params["bn2_b"])
    if "sc_w" in params:
        sc = bn(conv(x, params["sc_w"], stride, 0),
                params["sc_bn_g"], params["sc_bn_b"])
    else:
        sc = x
    return jax.nn.relu(out + sc)


# ---------------------------------------------------------------------------
# Main
# ---------------------------------------------------------------------------
if __name__ == "__main__":
    key = jax.random.PRNGKey(0)
    # Tolerances are loose-ish because the kernel uses bf16 MXU operands
    # (native on all TPU generations) while the reference is pure f32.
    ATOL, RTOL = 7.5e-2, 5e-2

    # --- test 1: projection shortcut (in_channels != out_channels) ---------
    B, Cin, Cout, L = 2, 4, 8, 16
    ks = jax.random.split(key, 9)
    params = {
        "conv1_w": 0.2 * jax.random.normal(ks[0], (Cout, Cin, 3), jnp.float32),
        "bn1_g": 1.0 + 0.1 * jax.random.normal(ks[1], (Cout,), jnp.float32),
        "bn1_b": 0.1 * jax.random.normal(ks[2], (Cout,), jnp.float32),
        "conv2_w": 0.2 * jax.random.normal(ks[3], (Cout, Cout, 3), jnp.float32),
        "bn2_g": 1.0 + 0.1 * jax.random.normal(ks[4], (Cout,), jnp.float32),
        "bn2_b": 0.1 * jax.random.normal(ks[5], (Cout,), jnp.float32),
        "sc_w": 0.2 * jax.random.normal(ks[6], (Cout, Cin, 1), jnp.float32),
        "sc_bn_g": 1.0 + 0.1 * jax.random.normal(ks[7], (Cout,), jnp.float32),
        "sc_bn_b": 0.1 * jax.random.normal(ks[8], (Cout,), jnp.float32),
    }
    x = jax.random.normal(jax.random.PRNGKey(42), (B, Cin, L), jnp.float32)

    out = jax.block_until_ready(lightweight_residual_block(x, params))
    ref = jax.block_until_ready(_ref_forward(x, params))
    assert out.shape == (B, Cout, L), out.shape
    assert jnp.allclose(out, ref, atol=ATOL, rtol=RTOL), float(
        jnp.max(jnp.abs(out - ref)))

    # --- test 2: identity shortcut (in_channels == out_channels) -----------
    C = 8
    ks2 = jax.random.split(jax.random.PRNGKey(1), 6)
    params_id = {
        "conv1_w": 0.2 * jax.random.normal(ks2[0], (C, C, 3), jnp.float32),
        "bn1_g": 1.0 + 0.1 * jax.random.normal(ks2[1], (C,), jnp.float32),
        "bn1_b": 0.1 * jax.random.normal(ks2[2], (C,), jnp.float32),
        "conv2_w": 0.2 * jax.random.normal(ks2[3], (C, C, 3), jnp.float32),
        "bn2_g": 1.0 + 0.1 * jax.random.normal(ks2[4], (C,), jnp.float32),
        "bn2_b": 0.1 * jax.random.normal(ks2[5], (C,), jnp.float32),
    }
    x2 = jax.random.normal(jax.random.PRNGKey(43), (B, C, L), jnp.float32)

    out2 = jax.block_until_ready(lightweight_residual_block(x2, params_id))
    ref2 = jax.block_until_ready(_ref_forward(x2, params_id))
    assert out2.shape == (B, C, L), out2.shape
    assert jnp.allclose(out2, ref2, atol=ATOL, rtol=RTOL), float(
        jnp.max(jnp.abs(out2 - ref2)))

    print("KERNEL_OK")
</pallas_src>

<mosaic_0001>
module attributes {stable_mosaic.version = 11 : i64} {
  func.func @_resblock_kernel(%arg0: memref<8x256xf32, #tpu.memory_space<vmem>>, %arg1: memref<3x8x8xbf16, #tpu.memory_space<vmem>>, %arg2: memref<8x1xf32, #tpu.memory_space<vmem>>, %arg3: memref<8x1xf32, #tpu.memory_space<vmem>>, %arg4: memref<3x8x8xbf16, #tpu.memory_space<vmem>>, %arg5: memref<8x1xf32, #tpu.memory_space<vmem>>, %arg6: memref<8x1xf32, #tpu.memory_space<vmem>>, %arg7: memref<8x8xbf16, #tpu.memory_space<vmem>>, %arg8: memref<8x1xf32, #tpu.memory_space<vmem>>, %arg9: memref<8x1xf32, #tpu.memory_space<vmem>>, %arg10: memref<1x256xf32, #tpu.memory_space<vmem>>, %arg11: memref<8x256xf32, #tpu.memory_space<vmem>>) attributes {dimension_semantics = [], scalar_prefetch = 0 : i64, scratch_operands = 0 : i64, tpu.core_type = #tpu.core_type<tc>} {
    %c0 = arith.constant 0 : index
    %c0_0 = arith.constant 0 : index
    %0 = vector.load %arg10[%c0, %c0_0] : memref<1x256xf32, #tpu.memory_space<vmem>>, vector<1x256xf32>
    %c0_1 = arith.constant 0 : index
    %c0_2 = arith.constant 0 : index
    %1 = vector.load %arg0[%c0_1, %c0_2] : memref<8x256xf32, #tpu.memory_space<vmem>>, vector<8x256xf32>
    %c1_i32 = arith.constant 1 : i32
    %2 = tpu.dynamic_rotate %1 by %c1_i32 dim 1 : vector<8x256xf32>, i32 -> vector<8x256xf32>
    %c255_i32 = arith.constant 255 : i32
    %3 = tpu.dynamic_rotate %1 by %c255_i32 dim 1 : vector<8x256xf32>, i32 -> vector<8x256xf32>
    %c1 = arith.constant 1 : index
    %c0_3 = arith.constant 0 : index
    %c0_4 = arith.constant 0 : index
    %4 = vector.load %arg1[%c1, %c0_3, %c0_4] : memref<3x8x8xbf16, #tpu.memory_space<vmem>>, vector<1x8x8xbf16>
    %5 = vector.shape_cast %4 : vector<1x8x8xbf16> to vector<8x8xbf16>
    %6 = arith.truncf %1 : vector<8x256xf32> to vector<8x256xbf16>
    %cst = arith.constant dense<0.000000e+00> : vector<8x256xf32>
    %7 = tpu.matmul %5, %6, %cst {dimension_numbers = #tpu.dot_dimension_numbers<[1], [0], [0], [1], [0, 0, 1, 1], [], []>} : vector<8x8xbf16>, vector<8x256xbf16>, vector<8x256xf32> -> vector<8x256xf32>
    %c0_5 = arith.constant 0 : index
    %c0_6 = arith.constant 0 : index
    %c0_7 = arith.constant 0 : index
    %8 = vector.load %arg1[%c0_5, %c0_6, %c0_7] : memref<3x8x8xbf16, #tpu.memory_space<vmem>>, vector<1x8x8xbf16>
    %9 = vector.shape_cast %8 : vector<1x8x8xbf16> to vector<8x8xbf16>
    %10 = arith.truncf %2 : vector<8x256xf32> to vector<8x256xbf16>
    %cst_8 = arith.constant dense<0.000000e+00> : vector<8x256xf32>
    %11 = tpu.matmul %9, %10, %cst_8 {dimension_numbers = #tpu.dot_dimension_numbers<[1], [0], [0], [1], [0, 0, 1, 1], [], []>} : vector<8x8xbf16>, vector<8x256xbf16>, vector<8x256xf32> -> vector<8x256xf32>
    %12 = arith.addf %7, %11 : vector<8x256xf32>
    %c2 = arith.constant 2 : index
    %c0_9 = arith.constant 0 : index
    %c0_10 = arith.constant 0 : index
    %13 = vector.load %arg1[%c2, %c0_9, %c0_10] : memref<3x8x8xbf16, #tpu.memory_space<vmem>>, vector<1x8x8xbf16>
    %14 = vector.shape_cast %13 : vector<1x8x8xbf16> to vector<8x8xbf16>
    %15 = arith.truncf %3 : vector<8x256xf32> to vector<8x256xbf16>
    %cst_11 = arith.constant dense<0.000000e+00> : vector<8x256xf32>
    %16 = tpu.matmul %14, %15, %cst_11 {dimension_numbers = #tpu.dot_dimension_numbers<[1], [0], [0], [1], [0, 0, 1, 1], [], []>} : vector<8x8xbf16>, vector<8x256xbf16>, vector<8x256xf32> -> vector<8x256xf32>
    %17 = arith.addf %12, %16 : vector<8x256xf32>
    %18 = vector.broadcast %0 : vector<1x256xf32> to vector<8x256xf32>
    %19 = arith.mulf %17, %18 : vector<8x256xf32>
    %c0_12 = arith.constant 0 : index
    %c0_13 = arith.constant 0 : index
    %20 = vector.load %arg2[%c0_12, %c0_13] : memref<8x1xf32, #tpu.memory_space<vmem>>, vector<8x1xf32>
    %c0_14 = arith.constant 0 : index
    %c0_15 = arith.constant 0 : index
    %21 = vector.load %arg3[%c0_14, %c0_15] : memref<8x1xf32, #tpu.memory_space<vmem>>, vector<8x1xf32>
    %cst_16 = arith.constant dense<0.000000e+00> : vector<8xf32>
    %22 = vector.multi_reduction <add>, %19, %cst_16 [1] : vector<8x256xf32> to vector<8xf32>
    %23 = vector.shape_cast %22 : vector<8xf32> to vector<8x1xf32>
    %cst_17 = arith.constant 3.125000e-02 : f32
    %24 = vector.broadcast %cst_17 : f32 to vector<8x1xf32>
    %25 = arith.mulf %23, %24 : vector<8x1xf32>
    %26 = arith.mulf %19, %19 : vector<8x256xf32>
    %cst_18 = arith.constant dense<0.000000e+00> : vector<8xf32>
    %27 = vector.multi_reduction <add>, %26, %cst_18 [1] : vector<8x256xf32> to vector<8xf32>
    %28 = vector.shape_cast %27 : vector<8xf32> to vector<8x1xf32>
    %cst_19 = arith.constant 3.125000e-02 : f32
    %29 = vector.broadcast %cst_19 : f32 to vector<8x1xf32>
    %30 = arith.mulf %28, %29 : vector<8x1xf32>
    %31 = arith.mulf %25, %25 : vector<8x1xf32>
    %32 = arith.subf %30, %31 : vector<8x1xf32>
    %cst_20 = arith.constant 9.99999974E-6 : f32
    %33 = vector.broadcast %cst_20 : f32 to vector<8x1xf32>
    %34 = arith.addf %32, %33 : vector<8x1xf32>
    %35 = math.rsqrt %34 : vector<8x1xf32>
    %36 = arith.mulf %20, %35 : vector<8x1xf32>
    %37 = arith.mulf %25, %36 : vector<8x1xf32>
    %38 = arith.subf %21, %37 : vector<8x1xf32>
    %39 = vector.broadcast %36 : vector<8x1xf32> to vector<8x256xf32>
    %40 = arith.mulf %19, %39 : vector<8x256xf32>
    %41 = vector.broadcast %38 : vector<8x1xf32> to vector<8x256xf32>
    %42 = arith.addf %40, %41 : vector<8x256xf32>
    %cst_21 = arith.constant 0.000000e+00 : f32
    %43 = vector.broadcast %cst_21 : f32 to vector<8x256xf32>
    %44 = arith.maximumf %42, %43 : vector<8x256xf32>
    %45 = vector.broadcast %0 : vector<1x256xf32> to vector<8x256xf32>
    %46 = arith.mulf %44, %45 : vector<8x256xf32>
    %c1_i32_22 = arith.constant 1 : i32
    %47 = tpu.dynamic_rotate %46 by %c1_i32_22 dim 1 : vector<8x256xf32>, i32 -> vector<8x256xf32>
    %c255_i32_23 = arith.constant 255 : i32
    %48 = tpu.dynamic_rotate %46 by %c255_i32_23 dim 1 : vector<8x256xf32>, i32 -> vector<8x256xf32>
    %c1_24 = arith.constant 1 : index
    %c0_25 = arith.constant 0 : index
    %c0_26 = arith.constant 0 : index
    %49 = vector.load %arg4[%c1_24, %c0_25, %c0_26] : memref<3x8x8xbf16, #tpu.memory_space<vmem>>, vector<1x8x8xbf16>
    %50 = vector.shape_cast %49 : vector<1x8x8xbf16> to vector<8x8xbf16>
    %51 = arith.truncf %46 : vector<8x256xf32> to vector<8x256xbf16>
    %cst_27 = arith.constant dense<0.000000e+00> : vector<8x256xf32>
    %52 = tpu.matmul %50, %51, %cst_27 {dimension_numbers = #tpu.dot_dimension_numbers<[1], [0], [0], [1], [0, 0, 1, 1], [], []>} : vector<8x8xbf16>, vector<8x256xbf16>, vector<8x256xf32> -> vector<8x256xf32>
    %c0_28 = arith.constant 0 : index
    %c0_29 = arith.constant 0 : index
    %c0_30 = arith.constant 0 : index
    %53 = vector.load %arg4[%c0_28, %c0_29, %c0_30] : memref<3x8x8xbf16, #tpu.memory_space<vmem>>, vector<1x8x8xbf16>
    %54 = vector.shape_cast %53 : vector<1x8x8xbf16> to vector<8x8xbf16>
    %55 = arith.truncf %47 : vector<8x256xf32> to vector<8x256xbf16>
    %cst_31 = arith.constant dense<0.000000e+00> : vector<8x256xf32>
    %56 = tpu.matmul %54, %55, %cst_31 {dimension_numbers = #tpu.dot_dimension_numbers<[1], [0], [0], [1], [0, 0, 1, 1], [], []>} : vector<8x8xbf16>, vector<8x256xbf16>, vector<8x256xf32> -> vector<8x256xf32>
    %57 = arith.addf %52, %56 : vector<8x256xf32>
    %c2_32 = arith.constant 2 : index
    %c0_33 = arith.constant 0 : index
    %c0_34 = arith.constant 0 : index
    %58 = vector.load %arg4[%c2_32, %c0_33, %c0_34] : memref<3x8x8xbf16, #tpu.memory_space<vmem>>, vector<1x8x8xbf16>
    %59 = vector.shape_cast %58 : vector<1x8x8xbf16> to vector<8x8xbf16>
    %60 = arith.truncf %48 : vector<8x256xf32> to vector<8x256xbf16>
    %cst_35 = arith.constant dense<0.000000e+00> : vector<8x256xf32>
    %61 = tpu.matmul %59, %60, %cst_35 {dimension_numbers = #tpu.dot_dimension_numbers<[1], [0], [0], [1], [0, 0, 1, 1], [], []>} : vector<8x8xbf16>, vector<8x256xbf16>, vector<8x256xf32> -> vector<8x256xf32>
    %62 = arith.addf %57, %61 : vector<8x256xf32>
    %63 = vector.broadcast %0 : vector<1x256xf32> to vector<8x256xf32>
    %64 = arith.mulf %62, %63 : vector<8x256xf32>
    %c0_36 = arith.constant 0 : index
    %c0_37 = arith.constant 0 : index
    %65 = vector.load %arg5[%c0_36, %c0_37] : memref<8x1xf32, #tpu.memory_space<vmem>>, vector<8x1xf32>
    %c0_38 = arith.constant 0 : index
    %c0_39 = arith.constant 0 : index
    %66 = vector.load %arg6[%c0_38, %c0_39] : memref<8x1xf32, #tpu.memory_space<vmem>>, vector<8x1xf32>
    %cst_40 = arith.constant dense<0.000000e+00> : vector<8xf32>
    %67 = vector.multi_reduction <add>, %64, %cst_40 [1] : vector<8x256xf32> to vector<8xf32>
    %68 = vector.shape_cast %67 : vector<8xf32> to vector<8x1xf32>
    %cst_41 = arith.constant 3.125000e-02 : f32
    %69 = vector.broadcast %cst_41 : f32 to vector<8x1xf32>
    %70 = arith.mulf %68, %69 : vector<8x1xf32>
    %71 = arith.mulf %64, %64 : vector<8x256xf32>
    %cst_42 = arith.constant dense<0.000000e+00> : vector<8xf32>
    %72 = vector.multi_reduction <add>, %71, %cst_42 [1] : vector<8x256xf32> to vector<8xf32>
    %73 = vector.shape_cast %72 : vector<8xf32> to vector<8x1xf32>
    %cst_43 = arith.constant 3.125000e-02 : f32
    %74 = vector.broadcast %cst_43 : f32 to vector<8x1xf32>
    %75 = arith.mulf %73, %74 : vector<8x1xf32>
    %76 = arith.mulf %70, %70 : vector<8x1xf32>
    %77 = arith.subf %75, %76 : vector<8x1xf32>
    %cst_44 = arith.constant 9.99999974E-6 : f32
    %78 = vector.broadcast %cst_44 : f32 to vector<8x1xf32>
    %79 = arith.addf %77, %78 : vector<8x1xf32>
    %80 = math.rsqrt %79 : vector<8x1xf32>
    %81 = arith.mulf %65, %80 : vector<8x1xf32>
    %82 = arith.mulf %70, %81 : vector<8x1xf32>
    %83 = arith.subf %66, %82 : vector<8x1xf32>
    %c0_45 = arith.constant 0 : index
    %c0_46 = arith.constant 0 : index
    %84 = vector.load %arg7[%c0_45, %c0_46] : memref<8x8xbf16, #tpu.memory_space<vmem>>, vector<8x8xbf16>
    %85 = arith.truncf %1 : vector<8x256xf32> to vector<8x256xbf16>
    %cst_47 = arith.constant dense<0.000000e+00> : vector<8x256xf32>
    %86 = tpu.matmul %84, %85, %cst_47 {dimension_numbers = #tpu.dot_dimension_numbers<[1], [0], [0], [1], [0, 0, 1, 1], [], []>} : vector<8x8xbf16>, vector<8x256xbf16>, vector<8x256xf32> -> vector<8x256xf32>
    %c0_48 = arith.constant 0 : index
    %c0_49 = arith.constant 0 : index
    %87 = vector.load %arg8[%c0_48, %c0_49] : memref<8x1xf32, #tpu.memory_space<vmem>>, vector<8x1xf32>
    %c0_50 = arith.constant 0 : index
    %c0_51 = arith.constant 0 : index
    %88 = vector.load %arg9[%c0_50, %c0_51] : memref<8x1xf32, #tpu.memory_space<vmem>>, vector<8x1xf32>
    %cst_52 = arith.constant dense<0.000000e+00> : vector<8xf32>
    %89 = vector.multi_reduction <add>, %86, %cst_52 [1] : vector<8x256xf32> to vector<8xf32>
    %90 = vector.shape_cast %89 : vector<8xf32> to vector<8x1xf32>
    %cst_53 = arith.constant 3.125000e-02 : f32
    %91 = vector.broadcast %cst_53 : f32 to vector<8x1xf32>
    %92 = arith.mulf %90, %91 : vector<8x1xf32>
    %93 = arith.mulf %86, %86 : vector<8x256xf32>
    %cst_54 = arith.constant dense<0.000000e+00> : vector<8xf32>
    %94 = vector.multi_reduction <add>, %93, %cst_54 [1] : vector<8x256xf32> to vector<8xf32>
    %95 = vector.shape_cast %94 : vector<8xf32> to vector<8x1xf32>
    %cst_55 = arith.constant 3.125000e-02 : f32
    %96 = vector.broadcast %cst_55 : f32 to vector<8x1xf32>
    %97 = arith.mulf %95, %96 : vector<8x1xf32>
    %98 = arith.mulf %92, %92 : vector<8x1xf32>
    %99 = arith.subf %97, %98 : vector<8x1xf32>
    %cst_56 = arith.constant 9.99999974E-6 : f32
    %100 = vector.broadcast %cst_56 : f32 to vector<8x1xf32>
    %101 = arith.addf %99, %100 : vector<8x1xf32>
    %102 = math.rsqrt %101 : vector<8x1xf32>
    %103 = arith.mulf %87, %102 : vector<8x1xf32>
    %104 = arith.mulf %92, %103 : vector<8x1xf32>
    %105 = arith.subf %88, %104 : vector<8x1xf32>
    %106 = vector.broadcast %103 : vector<8x1xf32> to vector<8x256xf32>
    %107 = arith.mulf %86, %106 : vector<8x256xf32>
    %108 = vector.broadcast %105 : vector<8x1xf32> to vector<8x256xf32>
    %109 = arith.addf %107, %108 : vector<8x256xf32>
    %110 = vector.broadcast %81 : vector<8x1xf32> to vector<8x256xf32>
    %111 = arith.mulf %64, %110 : vector<8x256xf32>
    %112 = vector.broadcast %83 : vector<8x1xf32> to vector<8x256xf32>
    %113 = arith.addf %111, %112 : vector<8x256xf32>
    %114 = arith.addf %113, %109 : vector<8x256xf32>
    %cst_57 = arith.constant 0.000000e+00 : f32
    %115 = vector.broadcast %cst_57 : f32 to vector<8x256xf32>
    %116 = arith.maximumf %114, %115 : vector<8x256xf32>
    %c0_58 = arith.constant 0 : index
    %c0_59 = arith.constant 0 : index
    %117 = vector.load %arg11[%c0_58, %c0_59] : memref<8x256xf32, #tpu.memory_space<vmem>>, vector<8x256xf32>
    tpu.vector_store %arg11[%c0_58, %c0_59], %116 {strides = array<i32>} : memref<8x256xf32, #tpu.memory_space<vmem>>, vector<8x256xf32>,
    return
  }
}

</mosaic_0001>

<bundles_post_ra>
// kernel: tpu_custom_call.1
= control target key start
LH: loop header
LB: loop body
LE: loop exit
PB: predicated region body
PF: predicated region fallthrough
CT: control target
= control target key end

     0   :  { %vm70_vm0 = vcmask 1043456   ;;  %v654_v5 = vmov 0   ;;  %s852_s0 = inlined_call_operand.vmem [shape: f32[8,256], index: 0, kind: input, shape index: {}]   ;;  %s853_s1 = inlined_call_operand.vmem [shape: bf16[3,8,8], index: 1, kind: input, shape index: {}]   ;;  %s854_s2 = inlined_call_operand.vmem [shape: f32[8,1], index: 2, kind: input, shape index: {}]   ;;  %s855_s3 = inlined_call_operand.vmem [shape: f32[8,1], index: 3, kind: input, shape index: {}]   ;;  %s856_s4 = inlined_call_operand.vmem [shape: bf16[3,8,8], index: 4, kind: input, shape index: {}]   ;;  %s857_s5 = inlined_call_operand.vmem [shape: f32[8,1], index: 5, kind: input, shape index: {}]   ;;  %s858_s6 = inlined_call_operand.vmem [shape: f32[8,1], index: 6, kind: input, shape index: {}]   ;;  %s859_s7 = inlined_call_operand.vmem [shape: bf16[8,8], index: 7, kind: input, shape index: {}]   ;;  %s860_s8 = inlined_call_operand.vmem [shape: f32[8,1], index: 8, kind: input, shape index: {}]   ;;  %s861_s9 = inlined_call_operand.vmem [shape: f32[8,1], index: 9, kind: input, shape index: {}]   ;;  %s862_s10 = inlined_call_operand.vmem [shape: f32[1,256], index: 10, kind: input, shape index: {}]   ;;  %s863_s11 = inlined_call_operand.hbm [shape: f32[8,256], index: 11, kind: output, shape index: {}]  }
   0x1   :  { %v41_v0 = vld [vmem:[%s852_s0] sm:$0xff]  ;;  %v42_v1 = vld [vmem:[%s852_s0 + $0x8] sm:$0xff]  ;;  %109 = vmatprep.mubr.bf16.mxu0 %v654_v5  ;;  %159 = vmatprep.mubr.bf16.mxu1 %v654_v5 }
   0x2   :  { %v604_v2 = vpack.i.bf16 %v42_v1, %v41_v0  ;;  %v724_v3 = vpack.c.bf16 %v42_v1, %v42_v1  ;;  %v61_v4 = vpack.c.bf16 %v41_v0, %v41_v0  ;;  %614 = vset.pattern.permute.xlu0 %v654_v5 }
   0x3   :  { %16 = vsyncpa [#allocation3], 0  ;;  %s655_s21 = smov 1   ;;  %vm66_vm1 = vcmask 64512   ;;  %v582_v7 = vld [vmem:[%s853_s1 + $0x4] sm:$0xf]  ;;  %615 = vset.pattern.permute.xlu1 %v654_v5  ;;  %v47_v8 = vlaneseq }
   0x4   :  { %605 = vrot.lane.b32.xlu0 %v604_v2, %s655_s21  ;;  %585 = vmatprep.subr.msk.bf16.mxu1 %vm70_vm0, %v724_v3  ;;  %v733_v6 = vsel %vm70_vm0, %v61_v4, 0  ;;  %s656_s23 = smov 127   ;;  %v63_v22 = vld [vmem:[%s853_s1] sm:$0xf]  ;;  %v587_v27 = vld [vmem:[%s853_s1 + $0x8] sm:$0xf] }
   0x5   :  { %142 = vmatpush1.bf16.msra.mxu1 %v733_v6  ;;  %v743_v9 = vand.u32 127, %v47_v8  ;;  %v226_v33 = vshrl.u32 %v47_v8, 7  ;;  %v40_v39 = vld [vmem:[%s862_s10] sm:$0x3] }
   0x6   :  { %v237_v63 = vld [vmem:[%s854_s2] sm:$0xff] }
   0x7   :  { %vm49_vm2 = vcmp.lt.s32.totalorder %v743_v9, 1  ;;  %vm56_vm3 = vcmp.lt.s32.totalorder %v743_v9, 127  ;;  %v227_v36 = vsub.s32 0, %v226_v33  ;;  %v231_v37 = vsub.s32 1, %v226_v33 }
   0x8   :  { %610 = vrot.lane.b32.xlu0 %v604_v2, %s656_s23  ;;  %586 = vmatmul.mubr.msk.bf16.vlgmr.msra.gmra.mxu1 %vm66_vm1, %v582_v7  ;;  %v238_v2 = vld [vmem:[%s855_s3] sm:$0xff] }
   0x9   :  { %334 = vmatprep.mubr.bf16.mxu1 %v654_v5  ;;  %v772_v44 = vrot.slane %v40_v39, %v227_v36  ;;  %v774_v45 = vrot.slane %v40_v39, %v231_v37 }
  0x76   :  { %v606_v10 = vpop.permute.xlu0 %605 }
  0x77   :  { %v608_v11 = vunpack.i.h.bf16 %v606_v10  ;;  %v607_v12 = vunpack.i.l.bf16 %v606_v10 }
  0x79   :  { %v50_v13 = vsel %vm49_vm2, %v607_v12, %v608_v11  ;;  %v51_v14 = vsel %vm49_vm2, %v608_v11, %v607_v12 }
  0x7a   :  { %v65_v15 = vpack.c.bf16 %v50_v13, %v50_v13  ;;  %v64_v16 = vpack.c.bf16 %v51_v14, %v51_v14  ;;  %v611_v17 = vpop.permute.xlu0 %610 }
  0x7b   :  { %v613_v18 = vunpack.i.h.bf16 %v611_v17  ;;  %v612_v19 = vunpack.i.l.bf16 %v611_v17 }
  0x7c   :  { %583 = vmatprep.subr.msk.bf16.mxu0 %vm70_vm0, %v65_v15  ;;  %v72_v20 = vsel %vm70_vm0, %v64_v16, 0 }
  0x7d   :  { %92 = vmatpush1.bf16.msra.mxu0 %v72_v20  ;;  %v58_v21 = vsel %vm56_vm3, %v613_v18, %v612_v19  ;;  %v57_v23 = vsel %vm56_vm3, %v612_v19, %v613_v18 }
  0x7e   :  { %v171_v24 = vpack.c.bf16 %v58_v21, %v58_v21  ;;  %v170_v25 = vpack.c.bf16 %v57_v23, %v57_v23  ;;  %v590_v23 = vld [vmem:[%s856_s4 + $0x4] sm:$0xf] }
  0x80   :  { %584 = vmatmul.mubr.msk.bf16.vlgmr.msra.gmra.mxu0 %vm66_vm1, %v63_v22  ;;  %588 = vmatprep.subr.msk.bf16.mxu0 %vm70_vm0, %v171_v24  ;;  %v176_v26 = vsel %vm70_vm0, %v170_v25, 0  ;;  %v470_v24 = vld [vmem:[%s859_s7] sm:$0xf] }
  0x81   :  { %196 = vmatpush1.bf16.msra.mxu0 %v176_v26  ;;  %213 = vmatprep.mubr.bf16.mxu0 %v654_v5 }
  0x88   :  { %589 = vmatmul.mubr.msk.bf16.vlgmr.msra.gmra.mxu0 %vm66_vm1, %v587_v27 }
  0x89   :  { %384 = vmatprep.mubr.bf16.mxu0 %v654_v5 }
  0xc8   :  { %v161_v28 = vpop.f32.mrf.mxu1 }
  0xca   :  { %v163_v29 = vpop.f32.mrf.mxu1 }
  0xcc   :  { %v165_v30 = vpop.f32.mrf.mxu1 }
  0xce   :  { %v166_v31 = vpop.f32.mrf.mxu1 }
 0x140   :  { %v111_v32 = vpop.f32.mrf.mxu0 }
 0x141   :  { %v162_v40 = vadd.f32 %v161_v28, %v111_v32 }
 0x142   :  { %v113_v34 = vpop.f32.mrf.mxu0 }
 0x143   :  { %v164_v42 = vadd.f32 %v163_v29, %v113_v34 }
 0x144   :  { %v115_v35 = vpop.f32.mrf.mxu0 }
 0x145   :  { %v290_v35 = vld [vmem:[%s856_s4] sm:$0xf] }
 0x146   :  { %v116_v38 = vpop.f32.mrf.mxu0 }
 0x148   :  { %v215_v41 = vpop.f32.mrf.mxu0 }
 0x149   :  { %v222_v43 = vadd.f32 %v215_v41, %v162_v40  ;;  %v595_v40 = vld [vmem:[%s856_s4 + $0x8] sm:$0xf] }
 0x14a   :  { %v217_v46 = vpop.f32.mrf.mxu0 }
 0x14b   :  { %v223_v47 = vadd.f32 %v217_v46, %v164_v42  ;;  %v235_v49 = vmul.f32 %v772_v44, %v222_v43 }
 0x14c   :  { %v219_v48 = vpop.f32.mrf.mxu0 }
 0x14d   :  { %v236_v50 = vmul.f32 %v774_v45, %v223_v47  ;;  %v243_v54 = vmul.f32 %v235_v49, %v235_v49 }
 0x14e   :  { %v220_v51 = vpop.f32.mrf.mxu0 }
 0x14f   :  { %v239_v52 = vadd.f32 %v236_v50, %v235_v49  ;;  %v244_v53 = vmul.f32 %v236_v50, %v236_v50 }
 0x151   :  { %240 = vadd.xlane.f32.xlu1 %v239_v52  ;;  %v245_v55 = vadd.f32 %v244_v53, %v243_v54 }
 0x155   :  { %246 = vadd.xlane.f32.xlu1 %v245_v55 }
 0x1da   :  { %v241_v56 = vpop.xlane.xlu1 %240 }
 0x1db   :  { %v242_v57 = vmul.f32 0.03125, %v241_v56 }
 0x1dd   :  { %v249_v59 = vmul.f32 %v242_v57, %v242_v57 }
 0x1de   :  { %v247_v58 = vpop.xlane.xlu1 %246 }
 0x1df   :  { %v248_v60 = vmul.f32 0.03125, %v247_v58 }
 0x1e1   :  { %v250_v61 = vsub.f32 %v248_v60, %v249_v59 }
 0x1e3   :  { %v251_v62 = vadd.f32 1e-05, %v250_v61 }
 0x1e5   :  { %626 = vrsqrt.f32 %v251_v62 }
 0x1f2   :  { %v627_v0 = vpop.eup %626 }
 0x1f3   :  { %v253_v1 = vmul.f32 %v627_v0, %v237_v63 }
 0x1f5   :  { %258 = vperm.xlu0 %614, %v253_v1   ;;  %v254_v4 = vmul.f32 %v253_v1, %v242_v57 }
 0x1f7   :  { %v255_v7 = vsub.f32 %v238_v2, %v254_v4 }
 0x1f9   :  { %265 = vperm.xlu1 %615, %v255_v7  }
 0x270   :  { %v259_v8 = vpop.permute.xlu0 %258 }
 0x271   :  { %v261_v10 = vmul.f32 %v259_v8, %v235_v49  ;;  %v262_v11 = vmul.f32 %v259_v8, %v236_v50 }
 0x274   :  { %v266_v12 = vpop.permute.xlu1 %265 }
 0x275   :  { %v268_v13 = vadd.f32 %v266_v12, %v261_v10  ;;  %v269_v14 = vadd.f32 %v266_v12, %v262_v11 }
 0x277   :  { %v270_v15 = vmax.f32 %v268_v13, 0.0  ;;  %v271_v16 = vmax.f32 %v269_v14, 0.0 }
 0x279   :  { %v272_v17 = vmul.f32 %v270_v15, %v772_v44  ;;  %v273_v18 = vmul.f32 %v271_v16, %v774_v45 }
 0x27b   :  { %v289_v19 = vpack.c.bf16 %v273_v18, %v273_v18  ;;  %v616_v20 = vpack.i.bf16 %v273_v18, %v272_v17  ;;  %v288_v21 = vpack.c.bf16 %v272_v17, %v272_v17 }
 0x27d   :  { %593 = vmatprep.subr.msk.bf16.mxu0 %vm70_vm0, %v289_v19  ;;  %617 = vrot.lane.b32.xlu0 %v616_v20, %s655_s21  ;;  %v347_v22 = vsel %vm70_vm0, %v288_v21, 0 }
 0x27e   :  { %367 = vmatpush1.bf16.msra.mxu0 %v347_v22 }
 0x27f   :  { %598 = vmatprep.subr.msk.bf16.mxu0 %vm70_vm0, %v724_v3 }
 0x281   :  { %622 = vrot.lane.b32.xlu0 %v616_v20, %s656_s23  ;;  %594 = vmatmul.mubr.msk.bf16.vlgmr.msra.gmra.mxu0 %vm66_vm1, %v590_v23  ;;  %v451_v23 = vld [vmem:[%s857_s5] sm:$0xff]  ;;  %s657_s5 = smov [#allocation2]  }
 0x282   :  { %489 = vmatpush1.bf16.msra.mxu0 %v733_v6  ;;  %506 = vmatprep.mubr.bf16.mxu0 %v654_v5 }
 0x289   :  { %599 = vmatmul.mubr.msk.bf16.vlgmr.msra.gmra.mxu0 %vm66_vm1, %v470_v24 }
 0x2ef   :  { %v618_v25 = vpop.permute.xlu0 %617 }
 0x2f0   :  { %v620_v26 = vunpack.i.h.bf16 %v618_v25  ;;  %v619_v27 = vunpack.i.l.bf16 %v618_v25 }
 0x2f2   :  { %v278_v3 = vsel %vm49_vm2, %v619_v27, %v620_v26  ;;  %v279_v28 = vsel %vm49_vm2, %v620_v26, %v619_v27  ;;  %v515_v26 = vld [vmem:[%s860_s8] sm:$0xff]  ;;  %s574_s8 = sshll.u32 %s657_s5, 4  ;;  %s575_s8 = int_to_ptr.vmem [resolvable:$true] %s574_s8 }
 0x2f3   :  { %v292_v29 = vpack.c.bf16 %v278_v3, %v278_v3  ;;  %v623_v30 = vpop.permute.xlu0 %622  ;;  %v291_v6 = vpack.c.bf16 %v279_v28, %v279_v28  ;;  %v516_v28 = vld [vmem:[%s861_s9] sm:$0xff]  ;;  %p637_p1 = scmp.lt.s32.totalorder %s575_s8, %s575_s8 }
 0x2f4   :  { %v625_v31 = vunpack.i.h.bf16 %v623_v30  ;;  %v624_v32 = vunpack.i.l.bf16 %v623_v30 }
 0x2f5   :  { %591 = vmatprep.subr.msk.bf16.mxu1 %vm70_vm0, %v292_v29  ;;  %v297_v33 = vsel %vm70_vm0, %v291_v6, 0 }
 0x2f6   :  { %v285_v34 = vsel %vm56_vm3, %v625_v31, %v624_v32  ;;  %317 = vmatpush1.bf16.msra.mxu1 %v297_v33  ;;  %v284_v36 = vsel %vm56_vm3, %v624_v32, %v625_v31  ;;  %v452_v31 = vld [vmem:[%s858_s6] sm:$0xff]  ;;  %s632_s6 = scalar_lea.vmem %s575_s8, 256 }
 0x2f7   :  { %v396_v37 = vpack.c.bf16 %v285_v34, %v285_v34  ;;  %v395_v38 = vpack.c.bf16 %v284_v36, %v284_v36  ;;  %p633_p0 = scmp.ne.s32.totalorder %s575_s8, %s632_s6  ;;  %p638_p2 = scmp.lt.s32.totalorder %s632_s6, %s632_s6 }
 0x2f9   :  { %592 = vmatmul.mubr.msk.bf16.vlgmr.msra.gmra.mxu1 %vm66_vm1, %v290_v35  ;;  %596 = vmatprep.subr.msk.bf16.mxu1 %vm70_vm0, %v396_v37  ;;  %v401_v39 = vsel %vm70_vm0, %v395_v38, 0  ;;  %p639_p3 = por %p638_p2, %p637_p1 }
 0x2fa   :  { %421 = vmatpush1.bf16.msra.mxu1 %v401_v39  ;;  %438 = vmatprep.mubr.bf16.mxu1 %v654_v5 }
 0x2fb   :  { %p640_p4 = pnand %p639_p3, %p633_p0 }
 0x301   :  { %597 = vmatmul.mubr.msk.bf16.vlgmr.msra.gmra.mxu1 %vm66_vm1, %v595_v40 }
 0x341   :  { %v386_v41 = vpop.f32.mrf.mxu0 }
 0x343   :  { %v388_v9 = vpop.f32.mrf.mxu0 }
 0x345   :  { %v390_v42 = vpop.f32.mrf.mxu0 }
 0x347   :  { %v391_v43 = vpop.f32.mrf.mxu0 }
 0x349   :  { %v823_v46 = vpop.f32.mrf.mxu0 }
 0x34a   :  { %v521_v7 = vmul.f32 %v823_v46, %v823_v46 }
 0x34b   :  { %v825_v47 = vpop.f32.mrf.mxu0 }
 0x34c   :  { %v517_v48 = vadd.f32 %v825_v47, %v823_v46  ;;  %v522_v8 = vmul.f32 %v825_v47, %v825_v47 }
 0x34d   :  { %v512_v49 = vpop.f32.mrf.mxu0 }
 0x34e   :  { %518 = vadd.xlane.f32.xlu1 %v517_v48  ;;  %v523_v10 = vadd.f32 %v522_v8, %v521_v7 }
 0x34f   :  { %v513_v5 = vpop.f32.mrf.mxu0 }
 0x3b9   :  { %v336_v50 = vpop.f32.mrf.mxu1 }
 0x3ba   :  { %v387_v54 = vadd.f32 %v386_v41, %v336_v50 }
 0x3bb   :  { %v338_v51 = vpop.f32.mrf.mxu1 }
 0x3bc   :  { %v389_v56 = vadd.f32 %v388_v9, %v338_v51 }
 0x3bd   :  { %v340_v52 = vpop.f32.mrf.mxu1 }
 0x3bf   :  { %v341_v53 = vpop.f32.mrf.mxu1 }
 0x3c1   :  { %v440_v55 = vpop.f32.mrf.mxu1 }
 0x3c2   :  { %v447_v57 = vadd.f32 %v440_v55, %v387_v54 }
 0x3c3   :  { %v442_v58 = vpop.f32.mrf.mxu1 }
 0x3c4   :  { %v448_v59 = vadd.f32 %v442_v58, %v389_v56  ;;  %v449_v61 = vmul.f32 %v447_v57, %v772_v44 }
 0x3c5   :  { %v444_v60 = vpop.f32.mrf.mxu1 }
 0x3c6   :  { %v450_v62 = vmul.f32 %v448_v59, %v774_v45  ;;  %v457_v2 = vmul.f32 %v449_v61, %v449_v61 }
 0x3c7   :  { %v445_v63 = vpop.f32.mrf.mxu1 }
 0x3c8   :  { %v453_v0 = vadd.f32 %v450_v62, %v449_v61  ;;  %v458_v1 = vmul.f32 %v450_v62, %v450_v62 }
 0x3ca   :  { %454 = vadd.xlane.f32.xlu0 %v453_v0  ;;  %v459_v4 = vadd.f32 %v458_v1, %v457_v2 }
 0x3ce   :  { %460 = vadd.xlane.f32.xlu0 %v459_v4 }
 0x3d2   :  { %524 = vadd.xlane.f32.xlu0 %v523_v10 }
 0x3d7   :  { %v519_v44 = vpop.xlane.xlu1 %518 }
 0x3d8   :  { %v520_v15 = vmul.f32 0.03125, %v519_v44 }
 0x3da   :  { %v527_v19 = vmul.f32 %v520_v15, %v520_v15 }
 0x453   :  { %v455_v11 = vpop.xlane.xlu0 %454 }
 0x454   :  { %v456_v12 = vmul.f32 0.03125, %v455_v11 }
 0x456   :  { %v463_v45 = vmul.f32 %v456_v12, %v456_v12 }
 0x457   :  { %v461_v13 = vpop.xlane.xlu0 %460 }
 0x458   :  { %v462_v14 = vmul.f32 0.03125, %v461_v13 }
 0x45a   :  { %v464_v16 = vsub.f32 %v462_v14, %v463_v45 }
 0x45b   :  { %v525_v17 = vpop.xlane.xlu0 %524 }
 0x45c   :  { %v465_v18 = vadd.f32 1e-05, %v464_v16  ;;  %v526_v20 = vmul.f32 0.03125, %v525_v17 }
 0x45e   :  { %628 = vrsqrt.f32 %v465_v18  ;;  %v528_v21 = vsub.f32 %v526_v20, %v527_v19 }
 0x460   :  { %v529_v22 = vadd.f32 1e-05, %v528_v21 }
 0x462   :  { %630 = vrsqrt.f32 %v529_v22 }
 0x46b   :  { %v629_v24 = vpop.eup %628 }
 0x46c   :  { %v467_v25 = vmul.f32 %v629_v24, %v451_v23 }
 0x46e   :  { %550 = vperm.xlu0 %614, %v467_v25   ;;  %v468_v6 = vmul.f32 %v467_v25, %v456_v12 }
 0x46f   :  { %v631_v27 = vpop.eup %630 }
 0x470   :  { %v531_v3 = vmul.f32 %v631_v27, %v515_v26  ;;  %v469_v32 = vsub.f32 %v452_v31, %v468_v6 }
 0x472   :  { %536 = vperm.xlu1 %615, %v531_v3   ;;  %v532_v29 = vmul.f32 %v531_v3, %v520_v15 }
 0x474   :  { %v533_v30 = vsub.f32 %v516_v28, %v532_v29 }
 0x476   :  { %543 = vperm.xlu1 %615, %v533_v30  }
 0x47a   :  { %557 = vperm.xlu1 %615, %v469_v32  }
 0x4e9   :  { %v551_v34 = vpop.permute.xlu0 %550 }
 0x4ea   :  { %v553_v36 = vmul.f32 %v551_v34, %v449_v61  ;;  %v554_v37 = vmul.f32 %v551_v34, %v450_v62 }
 0x4ed   :  { %v537_v33 = vpop.permute.xlu1 %536 }
 0x4ee   :  { %v539_v38 = vmul.f32 %v537_v33, %v823_v46  ;;  %v540_v39 = vmul.f32 %v537_v33, %v825_v47 }
 0x4f1   :  { %v544_v35 = vpop.permute.xlu1 %543 }
 0x4f2   :  { %v546_v41 = vadd.f32 %v544_v35, %v539_v38  ;;  %v547_v9 = vadd.f32 %v544_v35, %v540_v39 }
 0x4f5   :  { %v558_v40 = vpop.permute.xlu1 %557 }
 0x4f6   :  { %v560_v42 = vadd.f32 %v558_v40, %v553_v36  ;;  %v561_v43 = vadd.f32 %v558_v40, %v554_v37 }
 0x4f8   :  { %v562_v48 = vadd.f32 %v560_v42, %v546_v41  ;;  %v563_v49 = vadd.f32 %v561_v43, %v547_v9 }
 0x4fa   :  { %v564_v5 = vmax.f32 %v562_v48, 0.0  ;;  %v565_v50 = vmax.f32 %v563_v49, 0.0 }
 0x4fc   :  { %566 = vst [vmem:[#allocation2] sm:$0xff] %v564_v5  ;;  %567 = vst [vmem:[#allocation2 + $0x8] sm:$0xff] %v565_v50 }
 0x4fd   :  { %643 = shalt.err (!%p640_p4)
}
 0x4fe   :  { %577 = dma.vmem_to_hbm [thread:$0]  %s575_s8, 256, %s863_s11, [#allocation3]  }
 0x4ff   :  { %652 = dma.done.wait [#allocation3], 256  }
 0x500   :  { %653 = vsyncadd [#allocation3], 4294967040 }
 0x501   :  { %581 = vsyncpa [#allocation3], 1 }

</bundles_post_ra>
